<compile_context>
chip_gen: v7x
topology: tpu7x:2x2x1
jax: 0.10.0
libtpu: 0.0.40
codegen_flags: <defaults>
</compile_context>

<pallas_src>
import functools

import jax
import jax.numpy as jnp
from jax.experimental import pallas as pl
from jax.experimental.pallas import tpu as pltpu

LANES = 128            # TPU lane width
ROW_BLOCK = 512        # (512, 128) f32 = 256 KiB per buffer (tiled path)
_TILED_MIN_B = 64 * 1024  # below this a single full-array block is cheaper


def _hybrid_kernel(theta_ref, out_ref, *, scale):
    """Elementwise hot path: E = (1 + sin(theta)) * 0.5 * scale."""
    t = theta_ref[...]
    out_ref[...] = (1.0 + jnp.sin(t)) * (0.5 * scale)


def hybrid_forward(x, *, n_qubits=1):
    """JAX/Pallas equivalent of Hybrid.forward.

    x: jnp array.  If x.shape == (1, 1) we take x[0] (torch branch), otherwise
    we squeeze.  Returns shape (1, B) float32 expectations.
    """
    if x.shape == (1, 1):
        thetas = x[0]
    else:
        thetas = jnp.squeeze(x)
    thetas = jnp.atleast_1d(thetas)
    if thetas.ndim != 1:
        raise ValueError(
            f"Hybrid expects one theta per batch element; got shape {x.shape} "
            "which does not squeeze to a vector.")
    thetas = thetas.astype(jnp.float32)
    b = thetas.shape[0]

    # n_qubits beyond ~30 would overflow / lose precision in the f32 scale.
    assert n_qubits <= 30, "decimal-bitstring scale not representable in f32"
    scale = float((10.0 ** n_qubits - 1.0) / 9.0)  # decimal-bitstring weighting
    kernel = functools.partial(_hybrid_kernel, scale=scale)

    if b < _TILED_MIN_B:
        # Realistic small-batch path: single full-array VMEM block, no grid,
        # no pad, no trim; input buffer donated to the output.
        thetas2d = thetas.reshape(1, b)
        return pl.pallas_call(
            kernel,
            out_shape=jax.ShapeDtypeStruct((1, b), jnp.float32),
            in_specs=[pl.BlockSpec(memory_space=pltpu.MemorySpace.VMEM)],
            out_specs=pl.BlockSpec(memory_space=pltpu.MemorySpace.VMEM),
            input_output_aliases={0: 0},
        )(thetas2d)

    # Large-B streaming path: sublane-dense (rows, 128) layout, parallel row
    # grid of (ROW_BLOCK, 128) blocks.  Pad/trim only when B % 128 != 0.
    rows = pl.cdiv(b, LANES)
    pad = rows * LANES - b
    flat = jnp.pad(thetas, (0, pad)) if pad else thetas
    x2d = flat.reshape(rows, LANES)

    out2d = pl.pallas_call(
        kernel,
        out_shape=jax.ShapeDtypeStruct((rows, LANES), jnp.float32),
        grid=(pl.cdiv(rows, ROW_BLOCK),),
        in_specs=[pl.BlockSpec((ROW_BLOCK, LANES), lambda i: (i, 0))],
        out_specs=pl.BlockSpec((ROW_BLOCK, LANES), lambda i: (i, 0)),
        input_output_aliases={0: 0},
        compiler_params=pltpu.CompilerParams(
            dimension_semantics=("parallel",)),
    )(x2d)

    out = out2d.reshape(1, rows * LANES)
    return out[:, :b] if pad else out


def _reference(x, n_qubits=1):
    """Pure-JAX reference for correctness checking."""
    if x.shape == (1, 1):
        thetas = x[0]
    else:
        thetas = jnp.squeeze(x)
    thetas = jnp.atleast_1d(thetas).astype(jnp.float32)
    scale = (10.0 ** n_qubits - 1.0) / 9.0
    return ((1.0 + jnp.sin(thetas)) * 0.5 * scale)[None, :]


if __name__ == "__main__":
    # Deterministic "module params": n_qubits=1 (shots/shift do not affect the
    # analytic forward pass).
    n_qubits = 1
    key = jax.random.PRNGKey(0)

    # Small input consistent with the module: a (B, 1) classical head output.
    x = jax.random.normal(key, (8, 1), dtype=jnp.float32)
    out = jax.block_until_ready(hybrid_forward(x, n_qubits=n_qubits))
    ref = _reference(x, n_qubits=n_qubits)
    assert out.shape == ref.shape == (1, 8), (out.shape, ref.shape)
    assert jnp.allclose(out, ref, atol=1e-5, rtol=1e-5), (out, ref)

    # Torch (1,1) special branch.
    x11 = jnp.array([[0.3]], dtype=jnp.float32)
    out11 = jax.block_until_ready(hybrid_forward(x11, n_qubits=n_qubits))
    assert out11.shape == (1, 1)
    assert jnp.allclose(out11, _reference(x11, n_qubits=n_qubits), atol=1e-5)

    # Exercise the tiled large-B path (parallel row grid, partial last block).
    x_big = jax.random.normal(jax.random.PRNGKey(1), (70000, 1),
                              dtype=jnp.float32)
    out_big = jax.block_until_ready(hybrid_forward(x_big, n_qubits=n_qubits))
    ref_big = _reference(x_big, n_qubits=n_qubits)
    assert out_big.shape == ref_big.shape == (1, 70000), (out_big.shape,
                                                          ref_big.shape)
    assert jnp.allclose(out_big, ref_big, atol=1e-5, rtol=1e-5)

    print("KERNEL_OK")
</pallas_src>

<mosaic_0001>
module attributes {stable_mosaic.version = 11 : i64} {
  func.func @_hybrid_kernel(%arg0: memref<1x8xf32, #tpu.memory_space<vmem>>, %arg1: memref<1x8xf32, #tpu.memory_space<vmem>>) attributes {dimension_semantics = [], scalar_prefetch = 0 : i64, scratch_operands = 0 : i64, tpu.core_type = #tpu.core_type<tc>} {
    %c0 = arith.constant 0 : index
    %c0_0 = arith.constant 0 : index
    %0 = vector.load %arg0[%c0, %c0_0] : memref<1x8xf32, #tpu.memory_space<vmem>>, vector<1x8xf32>
    %1 = math.sin %0 : vector<1x8xf32>
    %cst = arith.constant 1.000000e+00 : f32
    %2 = vector.broadcast %cst : f32 to vector<1x8xf32>
    %3 = arith.addf %2, %1 : vector<1x8xf32>
    %cst_1 = arith.constant 5.000000e-01 : f32
    %4 = vector.broadcast %cst_1 : f32 to vector<1x8xf32>
    %5 = arith.mulf %3, %4 : vector<1x8xf32>
    %c0_2 = arith.constant 0 : index
    %c0_3 = arith.constant 0 : index
    %6 = vector.load %arg1[%c0_2, %c0_3] : memref<1x8xf32, #tpu.memory_space<vmem>>, vector<1x8xf32>
    tpu.vector_store %arg1[%c0_2, %c0_3], %5 {strides = array<i32>} : memref<1x8xf32, #tpu.memory_space<vmem>>, vector<1x8xf32>,
    return
  }
}

</mosaic_0001>

<bundles_post_ra>
// kernel: tpu_custom_call.1
= control target key start
LH: loop header
LB: loop body
LE: loop exit
PB: predicated region body
PF: predicated region fallthrough
CT: control target
= control target key end

     0   :  { %6 = vsyncpa [#allocation3], 0  ;;  %s276_s0 = inlined_call_operand.hbm [shape: f32[1,8], index: 0, kind: input, shape index: {}, may-alias: {0,1}]   ;;  %s277_s1 = inlined_call_operand.hbm [shape: f32[1,8], index: 1, kind: output, shape index: {}, may-alias: {0,1}]  }
   0x1   :  { %7 = vsyncpa [#allocation4], 0  ;;  %s213_s6 = smov [#allocation2]   ;;  %s165_s10 = scalar_lea.hbm %s276_s0, 16 }
   0x2   :  { %s14_s7 = sshll.u32 %s213_s6, 4  ;;  %p166_p0 = scmp.ne.s32.totalorder %s276_s0, %s165_s10  ;;  %s15_s7 = int_to_ptr.vmem [resolvable:$true] %s14_s7 }
   0x3   :  { %p169_p1 = scmp.lt.u32.totalorder %s165_s10, %s276_s0 }
   0x5   :  { %p171_p2 = pnand %p169_p1, %p166_p0 }
   0x7   :  { %174 = shalt.err (!%p171_p2)
}
   0x8   :  { %s175_s15 = scalar_lea.vmem %s15_s7, 16  ;;  %s179_s16 = scalar_lea.vmem %s15_s7, 32 }
   0x9   :  { %p176_p3 = scmp.ne.s32.totalorder %s15_s7, %s175_s15  ;;  %p180_p4 = scmp.lt.s32.totalorder %s15_s7, %s15_s7 }
   0xa   :  { %p181_p5 = scmp.lt.s32.totalorder %s179_s16, %s175_s15 }
   0xc   :  { %p182_p6 = por %p181_p5, %p180_p4 }
   0xe   :  { %p183_p7 = pnand %p182_p6, %p176_p3 }
  0x10   :  { %186 = shalt.err (!%p183_p7)
}
  0x11   :  { %17 = dma.hbm_to_vmem [thread:$0]  %s276_s0, 16, %s15_s7, [#allocation3]  }
  0x12   :  { %209 = dma.done.wait [#allocation3], 16  }
  0x13   :  { %210 = vsyncadd [#allocation3], 4294967280  ;;  %v243_v0 = vld [vmem:[#allocation2] sm:$0x1]  ;;  %v214_v12 = vmov 683565275  }
  0x14   :  { %v25_v1 = vand.u32 2139095040, %v243_v0  ;;  %v22_v3 = vand.u32 2147483647, %v243_v0  ;;  %v215_v14 = vmov 2475754826   ;;  %vm24_vm7 = vcmp.lt.s32.totalorder %v243_v0, 0 }
  0x15   :  { %v216_v16 = vmov 2131351028   ;;  %v217_v18 = vmov 2102212464   ;;  %v218_v20 = vmov 920167782   ;;  %vm114_vm12 = vweird.f32 %v243_v0 }
  0x16   :  { %v26_v2 = vshrl.u32 %v25_v1, 23  ;;  %v29_v6 = vand.u32 8388607, %v22_v3  ;;  %v219_v27 = vmov 1326507024   ;;  %s220_s0 = smov [#allocation5]  }
  0x17   :  { %vm23_vm8 = vcmp.le.f32.partialorder %v22_v3, 0.7853982  ;;  %s136_s19 = sshll.u32 %s220_s0, 4  ;;  %vm128_vm13 = vcmask 57344   ;;  %s137_s19 = int_to_ptr.vmem [resolvable:$true] %s136_s19 }
  0x18   :  { %v145_v4 = vadd.s32 4294967169, %v26_v2  ;;  %v30_v9 = vor.u32 8388608, %v29_v6  ;;  %s187_s20 = scalar_lea.vmem %s137_s19, 16  ;;  %s191_s21 = scalar_lea.vmem %s137_s19, 32 }
  0x19   :  { %p188_p8 = scmp.ne.s32.totalorder %s137_s19, %s187_s20  ;;  %p192_p9 = scmp.lt.s32.totalorder %s137_s19, %s137_s19 }
  0x1a   :  { %v32_v5 = vadd.s32 1, %v145_v4  ;;  %v70_v29 = vshll.u32 %v30_v9, 8  ;;  %p193_p10 = scmp.lt.s32.totalorder %s191_s21, %s187_s20 }
  0x1c   :  { %vm33_vm0 = vcmp.gt.s32.totalorder %v32_v5, 0  ;;  %p194_p11 = por %p193_p10, %p192_p9 }
  0x1d   :  { %v34_v7 = vsel %vm33_vm0, %v32_v5, 0 }
  0x1e   :  { %v36_v8 = vand.u32 31, %v34_v7  ;;  %v35_v10 = vshrl.u32 %v34_v7, 5  ;;  %p195_p12 = pnand %p194_p11, %p188_p8 }
  0x20   :  { %v37_v11 = vsub.s32 32, %v36_v8  ;;  %v39_v13 = vshll.u32 %v214_v12, %v36_v8  ;;  %v42_v15 = vshll.u32 %v215_v14, %v36_v8  ;;  %v45_v17 = vshll.u32 %v216_v16, %v36_v8 }
  0x21   :  { %v48_v19 = vshll.u32 %v217_v18, %v36_v8  ;;  %v51_v21 = vshll.u32 %v218_v20, %v36_v8  ;;  %vm54_vm1 = vcmp.lt.s32.totalorder %v35_v10, 1  ;;  %vm57_vm2 = vcmp.lt.s32.totalorder %v35_v10, 4 }
  0x22   :  { %v38_v22 = vshrl.u32 %v214_v12, %v37_v11  ;;  %v40_v23 = vshrl.u32 %v215_v14, %v37_v11  ;;  %v43_v24 = vshrl.u32 %v216_v16, %v37_v11  ;;  %v46_v25 = vshrl.u32 %v217_v18, %v37_v11 }
  0x23   :  { %v49_v26 = vshrl.u32 %v218_v20, %v37_v11  ;;  %v52_v28 = vshrl.u32 %v219_v27, %v37_v11  ;;  %vm55_vm3 = vcmp.lt.s32.totalorder %v35_v10, 2  ;;  %vm56_vm4 = vcmp.lt.s32.totalorder %v35_v10, 3 }
  0x24   :  { %v41_v30 = vor.u32 %v40_v23, %v39_v13  ;;  %v44_v31 = vor.u32 %v43_v24, %v42_v15  ;;  %v47_v32 = vor.u32 %v46_v25, %v45_v17 }
  0x25   :  { %v50_v33 = vor.u32 %v49_v26, %v48_v19  ;;  %v53_v34 = vor.u32 %v52_v28, %v51_v21 }
  0x26   :  { %v58_v35 = vsel %vm54_vm1, %v38_v22, %v41_v30  ;;  %v59_v36 = vsel %vm57_vm2, %v47_v32, 2102212464  ;;  %v62_v37 = vsel %vm54_vm1, %v41_v30, %v44_v31  ;;  %v66_v38 = vsel %vm54_vm1, %v44_v31, %v47_v32 }
  0x27   :  { %v60_v39 = vsel %vm56_vm4, %v44_v31, %v59_v36  ;;  %v63_v40 = vsel %vm57_vm2, %v50_v33, 920167782  ;;  %v67_v41 = vsel %vm57_vm2, %v53_v34, 1326507024 }
  0x28   :  { %v64_v42 = vsel %vm56_vm4, %v47_v32, %v63_v40  ;;  %v68_v43 = vsel %vm56_vm4, %v50_v33, %v67_v41  ;;  %v61_v44 = vsel %vm55_vm3, %v58_v35, %v60_v39 }
  0x29   :  { %v65_v45 = vsel %vm55_vm3, %v62_v37, %v64_v42  ;;  %v69_v46 = vsel %vm55_vm3, %v66_v38, %v68_v43  ;;  %v77_v51 = vmul.u32 %v70_v29, %v61_v44 }
  0x2a   :  { %v249_v47 = vmul.u32.u64.low %v70_v29, %v69_v46  ;;  %v250_v48 = vmul.u32.u64.high %v70_v29, %v69_v46, %v249_v47  ;;  %v252_v49 = vmul.u32.u64.low %v70_v29, %v65_v45  ;;  %v253_v50 = vmul.u32.u64.high %v70_v29, %v65_v45, %v252_v49 }
  0x2c   :  { %vm79_vm5 = vc.u32 %v250_v48, %v252_v49  ;;  %v80_v52 = vadd.s32 1, %v253_v50  ;;  %v78_v63 = vadd.s32 %v252_v49, %v250_v48 }
  0x2e   :  { %v81_v53 = vsel %vm79_vm5, %v80_v52, %v253_v50 }
  0x2f   :  { %v82_v54 = vadd.s32 %v81_v53, %v77_v51 }
  0x31   :  { %v83_v55 = vadd.s32 536870912, %v82_v54 }
  0x33   :  { %v84_v56 = vshrl.u32 %v83_v55, 30 }
  0x35   :  { %v85_v57 = vshll.u32 %v84_v56, 30  ;;  %v108_v13 = vsub.s32 4, %v84_v56 }
  0x37   :  { %v86_v58 = vsub.s32 %v82_v54, %v85_v57  ;;  %v109_v16 = vsel %vm24_vm7, %v108_v13, %v84_v56 }
  0x38   :  { %v111_v19 = vsel %vm23_vm8, 0, %v109_v16 }
  0x39   :  { %v88_v59 = vsub.s32 0, %v86_v58  ;;  %v115_v20 = vadd.s32 3, %v111_v19 }
  0x3b   :  { %v146_v60 = vmin.u32 %v88_v59, %v86_v58  ;;  %v116_v21 = vand.u32 3, %v115_v20 }
  0x3d   :  { %v90_v61 = vclz %v146_v60  ;;  %vm121_vm9 = vcmp.eq.s32.totalorder %v116_v21, 2  ;;  %vm118_vm10 = vcmp.eq.s32.totalorder %v116_v21, 0  ;;  %vm117_vm11 = vcmp.lt.s32.totalorder %v116_v21, 2 }
  0x3f   :  { %v147_v62 = vadd.s32 4294967294, %v90_v61 }
  0x41   :  { %vm148_vm6 = vcmp.lt.s32.totalorder %v147_v62, 0 }
  0x42   :  { %v93_v1 = vsel %vm148_vm6, 0, %v147_v62 }
  0x43   :  { %v94_v2 = vsub.s32 32, %v93_v1  ;;  %v95_v4 = vshll.u32 %v86_v58, %v93_v1  ;;  %v98_v5 = vsub.s32 4294967266, %v93_v1 }
  0x45   :  { %v96_v6 = vshrl.u32 %v78_v63, %v94_v2  ;;  %v99_v7 = vadd.s32 127, %v98_v5 }
  0x47   :  { %v97_v8 = vor.u32 %v96_v6, %v95_v4  ;;  %v100_v9 = vshll.u32 %v99_v7, 23 }
  0x49   :  { %v101_v10 = vor.u32 4788187, %v100_v9  ;;  %v104_v11 = vcvt.s32.f32 %v97_v8 }
  0x4b   :  { %v102_v12 = vand.u32 2147483647, %v101_v10 }
  0x4d   :  { %v105_v14 = vmul.f32 %v104_v11, %v102_v12 }
  0x4f   :  { %v106_v15 = vxor.u32 2147483648, %v105_v14 }
  0x51   :  { %v107_v17 = vsel %vm24_vm7, %v106_v15, %v105_v14 }
  0x52   :  { %v110_v18 = vsel %vm23_vm8, %v243_v0, %v107_v17 }
  0x53   :  { %161 = vcosq.f32 %v110_v18 }
  0x54   :  { %163 = vsinq.f32 %v110_v18 }
  0x5d   :  { %v162_v22 = vpop.eup %161 }
  0x5e   :  { %v164_v23 = vpop.eup %163  ;;  %v122_v24 = vxor.u32 2147483648, %v162_v22 }
  0x5f   :  { %v119_v25 = vxor.u32 2147483648, %v164_v23 }
  0x60   :  { %v123_v3 = vsel %vm121_vm9, %v122_v24, %v164_v23 }
  0x61   :  { %v120_v26 = vsel %vm118_vm10, %v162_v22, %v119_v25 }
  0x62   :  { %v124_v27 = vsel %vm117_vm11, %v120_v26, %v123_v3 }
  0x63   :  { %v125_v28 = vsel %vm114_vm12, nan, %v124_v27 }
  0x64   :  { %v126_v29 = vadd.f32 1.0, %v125_v28 }
  0x66   :  { %v127_v30 = vmul.f32 0.5, %v126_v29 }
  0x68   :  { %129 = vst.msk [vmem:[#allocation5] sm:$0x1] %vm128_vm13, %v127_v30 }
  0x69   :  { %198 = shalt.err (!%p195_p12)
}
  0x6a   :  { %s199_s24 = scalar_lea.hbm %s277_s1, 16 }
  0x6b   :  { %p200_p13 = scmp.ne.s32.totalorder %s277_s1, %s199_s24  ;;  %p203_p0 = scmp.lt.u32.totalorder %s199_s24, %s277_s1 }
  0x6d   :  { %p205_p1 = pnand %p203_p0, %p200_p13 }
  0x6f   :  { %208 = shalt.err (!%p205_p1)
}
  0x70   :  { %139 = dma.vmem_to_hbm [thread:$0]  %s137_s19, 16, %s277_s1, [#allocation4]  }
  0x71   :  { %211 = dma.done.wait [#allocation4], 16  }
  0x72   :  { %212 = vsyncadd [#allocation4], 4294967280 }
  0x73   :  { %143 = vsyncpa [#allocation3], 1 }
  0x74   :  { %144 = vsyncpa [#allocation4], 1 }

</bundles_post_ra>
